<compile_context>
chip_gen: v6e
topology: v6e:2x2x1
jax: 0.10.0
libtpu: 0.0.40
codegen_flags: <defaults>
</compile_context>

<pallas_src>
import functools

import jax
import jax.numpy as jnp
from jax.experimental import pallas as pl
from jax.experimental.pallas import tpu as pltpu


def _round_up(x, m):
    return ((x + m - 1) // m) * m


def _pick_tile(b_pad, batch_tile):
    """Largest multiple of 256 that divides b_pad, capped at batch_tile.

    Keeps >= 2 grid steps when b_pad >= 512 so v7x can shard across its two
    TensorCores, and guarantees the (8, 128)-divisibility of every block.
    """
    cap = b_pad // 2 if b_pad >= 512 else b_pad
    cap = min(cap, max(256, (batch_tile // 256) * 256))
    tile = 256
    for cand in range(cap - cap % 256, 255, -256):
        if b_pad % cand == 0:
            tile = cand
            break
    return tile


def mlp_kernel(x_ref, w1_ref, b1_ref, w2_ref, b2_ref, w3_ref, b3_ref, o_ref):
    # Layer 1: (tile, 2E) bf16 @ (2E, H1) bf16 -> f32 accumulate, + bias, ReLU.
    h1 = jnp.dot(x_ref[...], w1_ref[...],
                 preferred_element_type=jnp.float32) + b1_ref[...]
    h1 = jnp.maximum(h1, 0.0)

    # Layer 2: cast activations back to bf16 for a single-pass MXU matmul.
    h2 = jnp.dot(h1.astype(w2_ref.dtype), w2_ref[...],
                 preferred_element_type=jnp.float32) + b2_ref[...]
    h2 = jnp.maximum(h2, 0.0)

    # Layer 3 (H2 -> 1): VPU multiply + lane reduction (XLU), no MXU transpose.
    o = jnp.sum(h2 * w3_ref[...], axis=-1, keepdims=True) + b3_ref[0]
    o_ref[...] = o.astype(o_ref.dtype)


@functools.partial(jax.jit, static_argnames=("batch_tile",))
def mlp_baseline_forward(users, items, params, *, batch_tile=1024):
    """Forward pass of MLP_Baseline.

    users, items: int32 (B,) indices.
    params: dict with user_emb, item_emb, w1, b1, w2, b2, w3, b3 (w* stored (in, out)).
    Returns float32 (B,) scores (matches torch `.squeeze()` for B > 1).
    """
    E = params["user_emb"].shape[1]
    H1 = params["w1"].shape[1]
    H2 = params["w2"].shape[1]
    D = 2 * E

    B = users.shape[0]
    B_pad = _round_up(B, 256)
    tile = _pick_tile(B_pad, batch_tile)
    n_tiles = B_pad // tile

    pad = B_pad - B
    users_p = jnp.pad(users, (0, pad))   # padded rows gather row 0, sliced off below
    items_p = jnp.pad(items, (0, pad))

    # Glue: gather + concat + bf16 cast fuse in XLA into a single (B_pad, 2E) bf16
    # intermediate (only the gathered rows are converted).
    # TODO(synk): fuse the gather into the kernel to eliminate this HBM intermediate.
    x = jnp.concatenate(
        [jnp.take(params["user_emb"], users_p, axis=0),
         jnp.take(params["item_emb"], items_p, axis=0)],
        axis=-1).astype(jnp.bfloat16)                            # (B_pad, 2E)

    w1 = params["w1"].astype(jnp.bfloat16)                       # (2E, H1)
    w2 = params["w2"].astype(jnp.bfloat16)                       # (H1, H2)
    b1 = params["b1"].reshape(1, H1).astype(jnp.float32)
    b2 = params["b2"].reshape(1, H2).astype(jnp.float32)
    w3 = params["w3"].reshape(1, H2).astype(jnp.float32)         # row form for VPU mul
    b3 = params["b3"].reshape(1).astype(jnp.float32)             # (1,) SMEM scalar

    out = pl.pallas_call(
        mlp_kernel,
        out_shape=jax.ShapeDtypeStruct((B_pad, 1), jnp.float32),
        grid_spec=pltpu.PrefetchScalarGridSpec(
            num_scalar_prefetch=0,
            grid=(n_tiles,),
            in_specs=[
                pl.BlockSpec((tile, D), lambda i: (i, 0)),        # streamed activations
                pl.BlockSpec((D, H1), lambda i: (0, 0)),          # W1, resident
                pl.BlockSpec((1, H1), lambda i: (0, 0)),          # b1
                pl.BlockSpec((H1, H2), lambda i: (0, 0)),         # W2, resident
                pl.BlockSpec((1, H2), lambda i: (0, 0)),          # b2
                pl.BlockSpec((1, H2), lambda i: (0, 0)),          # W3 row
                pl.BlockSpec(memory_space=pltpu.MemorySpace.SMEM),  # b3 scalar
            ],
            out_specs=pl.BlockSpec((tile, 1), lambda i: (i, 0)),
        ),
        compiler_params=pltpu.CompilerParams(
            dimension_semantics=("parallel",),
        ),
    )(x, w1, b1, w2, b2, w3, b3)

    return out.reshape(B_pad)[:B]


def init_params(key, num_users, num_items, embedding_dim=64, hidden_dims=(128, 64)):
    keys = jax.random.split(key, 8)
    d_in = embedding_dim * 2
    h1, h2 = hidden_dims

    def uinit(k, shape, fan_in):
        bound = 1.0 / jnp.sqrt(fan_in)
        return jax.random.uniform(k, shape, jnp.float32, -bound, bound)

    return {
        # nn.Embedding default init ~ N(0, 1)
        "user_emb": jax.random.normal(keys[0], (num_users, embedding_dim), jnp.float32),
        "item_emb": jax.random.normal(keys[1], (num_items, embedding_dim), jnp.float32),
        # nn.Linear stored transposed as (in, out) for x @ W
        "w1": uinit(keys[2], (d_in, h1), d_in),
        "b1": uinit(keys[3], (1, h1), d_in),
        "w2": uinit(keys[4], (h1, h2), h1),
        "b2": uinit(keys[5], (1, h2), h1),
        "w3": uinit(keys[6], (h2, 1), h2),
        "b3": uinit(keys[7], (1, 1), h2),
    }


if __name__ == "__main__":
    key = jax.random.PRNGKey(0)
    pkey, ukey, ikey = jax.random.split(key, 3)

    num_users, num_items = 100, 200
    embedding_dim = 64
    B = 16

    params = init_params(pkey, num_users, num_items, embedding_dim)
    users = jax.random.randint(ukey, (B,), 0, num_users, dtype=jnp.int32)
    items = jax.random.randint(ikey, (B,), 0, num_items, dtype=jnp.int32)

    out = jax.block_until_ready(mlp_baseline_forward(users, items, params))

    # Pure-JAX reference mirroring the kernel's bf16-in / f32-accumulate arithmetic.
    ue = jnp.take(params["user_emb"], users, axis=0)
    ie = jnp.take(params["item_emb"], items, axis=0)
    x = jnp.concatenate([ue, ie], axis=-1).astype(jnp.bfloat16)
    h1 = jnp.maximum(
        jnp.dot(x, params["w1"].astype(jnp.bfloat16),
                preferred_element_type=jnp.float32) + params["b1"], 0.0)
    h2 = jnp.maximum(
        jnp.dot(h1.astype(jnp.bfloat16), params["w2"].astype(jnp.bfloat16),
                preferred_element_type=jnp.float32) + params["b2"], 0.0)
    ref = (h2 @ params["w3"] + params["b3"]).reshape(B)

    assert out.shape == (B,)
    max_err = float(jnp.max(jnp.abs(out - ref)))
    assert jnp.allclose(out, ref, atol=2e-3, rtol=2e-3), max_err

    print("KERNEL_OK")
</pallas_src>

<mosaic_0001>
module attributes {stable_mosaic.version = 11 : i64} {
  func.func @mlp_kernel(%arg0: i32, %arg1: memref<256x128xbf16, #tpu.memory_space<vmem>>, %arg2: memref<128x128xbf16, #tpu.memory_space<vmem>>, %arg3: memref<1x128xf32, #tpu.memory_space<vmem>>, %arg4: memref<128x64xbf16, #tpu.memory_space<vmem>>, %arg5: memref<1x64xf32, #tpu.memory_space<vmem>>, %arg6: memref<1x64xf32, #tpu.memory_space<vmem>>, %arg7: memref<1xf32, #tpu.memory_space<smem>>, %arg8: memref<256x1xf32, #tpu.memory_space<vmem>>) attributes {dimension_semantics = [#tpu.dimension_semantics<parallel>], iteration_bounds = array<i64: 1>, scalar_prefetch = 0 : i64, scratch_operands = 0 : i64, tpu.core_type = #tpu.core_type<tc>, window_params = [{transform_indices = @transform_0, window_bounds = array<i64: 256, 128>}, {pipeline_mode = #tpu.pipeline_mode<synchronous>, transform_indices = @transform_1, window_bounds = array<i64: 128, 128>}, {pipeline_mode = #tpu.pipeline_mode<synchronous>, transform_indices = @transform_2, window_bounds = array<i64: 1, 128>}, {pipeline_mode = #tpu.pipeline_mode<synchronous>, transform_indices = @transform_3, window_bounds = array<i64: 128, 64>}, {pipeline_mode = #tpu.pipeline_mode<synchronous>, transform_indices = @transform_4, window_bounds = array<i64: 1, 64>}, {pipeline_mode = #tpu.pipeline_mode<synchronous>, transform_indices = @transform_5, window_bounds = array<i64: 1, 64>}, {transform_indices = @transform_6, window_bounds = array<i64: 1>}, {transform_indices = @transform_7, window_bounds = array<i64: 256, 1>}]} {
    %c0 = arith.constant 0 : index
    %c0_0 = arith.constant 0 : index
    %0 = vector.load %arg1[%c0, %c0_0] : memref<256x128xbf16, #tpu.memory_space<vmem>>, vector<256x128xbf16>
    %c0_1 = arith.constant 0 : index
    %c0_2 = arith.constant 0 : index
    %1 = vector.load %arg2[%c0_1, %c0_2] : memref<128x128xbf16, #tpu.memory_space<vmem>>, vector<128x128xbf16>
    %cst = arith.constant dense<0.000000e+00> : vector<256x128xf32>
    %2 = tpu.matmul %0, %1, %cst {dimension_numbers = #tpu.dot_dimension_numbers<[1], [0], [0], [1], [0, 0, 1, 1], [], []>} : vector<256x128xbf16>, vector<128x128xbf16>, vector<256x128xf32> -> vector<256x128xf32>
    %c0_3 = arith.constant 0 : index
    %c0_4 = arith.constant 0 : index
    %3 = vector.load %arg3[%c0_3, %c0_4] : memref<1x128xf32, #tpu.memory_space<vmem>>, vector<1x128xf32>
    %4 = vector.broadcast %3 : vector<1x128xf32> to vector<256x128xf32>
    %5 = arith.addf %2, %4 : vector<256x128xf32>
    %cst_5 = arith.constant 0.000000e+00 : f32
    %6 = vector.broadcast %cst_5 : f32 to vector<256x128xf32>
    %7 = arith.maximumf %5, %6 : vector<256x128xf32>
    %8 = arith.truncf %7 : vector<256x128xf32> to vector<256x128xbf16>
    %c0_6 = arith.constant 0 : index
    %c0_7 = arith.constant 0 : index
    %9 = vector.load %arg4[%c0_6, %c0_7] : memref<128x64xbf16, #tpu.memory_space<vmem>>, vector<128x64xbf16>
    %cst_8 = arith.constant dense<0.000000e+00> : vector<256x64xf32>
    %10 = tpu.matmul %8, %9, %cst_8 {dimension_numbers = #tpu.dot_dimension_numbers<[1], [0], [0], [1], [0, 0, 1, 1], [], []>} : vector<256x128xbf16>, vector<128x64xbf16>, vector<256x64xf32> -> vector<256x64xf32>
    %c0_9 = arith.constant 0 : index
    %c0_10 = arith.constant 0 : index
    %11 = vector.load %arg5[%c0_9, %c0_10] : memref<1x64xf32, #tpu.memory_space<vmem>>, vector<1x64xf32>
    %12 = vector.broadcast %11 : vector<1x64xf32> to vector<256x64xf32>
    %13 = arith.addf %10, %12 : vector<256x64xf32>
    %cst_11 = arith.constant 0.000000e+00 : f32
    %14 = vector.broadcast %cst_11 : f32 to vector<256x64xf32>
    %15 = arith.maximumf %13, %14 : vector<256x64xf32>
    %c0_12 = arith.constant 0 : index
    %c0_13 = arith.constant 0 : index
    %16 = vector.load %arg6[%c0_12, %c0_13] : memref<1x64xf32, #tpu.memory_space<vmem>>, vector<1x64xf32>
    %17 = vector.broadcast %16 : vector<1x64xf32> to vector<256x64xf32>
    %18 = arith.mulf %15, %17 : vector<256x64xf32>
    %cst_14 = arith.constant dense<0.000000e+00> : vector<256xf32>
    %19 = vector.multi_reduction <add>, %18, %cst_14 [1] : vector<256x64xf32> to vector<256xf32>
    %20 = vector.shape_cast %19 : vector<256xf32> to vector<256x1xf32>
    %c0_15 = arith.constant 0 : index
    %21 = memref.load %arg7[%c0_15] : memref<1xf32, #tpu.memory_space<smem>>
    %22 = vector.broadcast %21 : f32 to vector<256x1xf32>
    %23 = arith.addf %20, %22 : vector<256x1xf32>
    %c0_16 = arith.constant 0 : index
    %c0_17 = arith.constant 0 : index
    %24 = vector.load %arg8[%c0_16, %c0_17] : memref<256x1xf32, #tpu.memory_space<vmem>>, vector<256x1xf32>
    tpu.vector_store %arg8[%c0_16, %c0_17], %23 {strides = array<i32>} : memref<256x1xf32, #tpu.memory_space<vmem>>, vector<256x1xf32>,
    return
  }
  func.func @transform_0(%arg0: i32) -> (i32, i32) {
    %c0_i32 = arith.constant 0 : i32
    %c0_i32_0 = arith.constant 0 : i32
    return %arg0, %c0_i32 : i32, i32
  }
  func.func @transform_1(%arg0: i32) -> (i32, i32) {
    %c0_i32 = arith.constant 0 : i32
    %c0_i32_0 = arith.constant 0 : i32
    %c0_i32_1 = arith.constant 0 : i32
    return %c0_i32, %c0_i32_0 : i32, i32
  }
  func.func @transform_2(%arg0: i32) -> (i32, i32) {
    %c0_i32 = arith.constant 0 : i32
    %c0_i32_0 = arith.constant 0 : i32
    %c0_i32_1 = arith.constant 0 : i32
    return %c0_i32, %c0_i32_0 : i32, i32
  }
  func.func @transform_3(%arg0: i32) -> (i32, i32) {
    %c0_i32 = arith.constant 0 : i32
    %c0_i32_0 = arith.constant 0 : i32
    %c0_i32_1 = arith.constant 0 : i32
    return %c0_i32, %c0_i32_0 : i32, i32
  }
  func.func @transform_4(%arg0: i32) -> (i32, i32) {
    %c0_i32 = arith.constant 0 : i32
    %c0_i32_0 = arith.constant 0 : i32
    %c0_i32_1 = arith.constant 0 : i32
    return %c0_i32, %c0_i32_0 : i32, i32
  }
  func.func @transform_5(%arg0: i32) -> (i32, i32) {
    %c0_i32 = arith.constant 0 : i32
    %c0_i32_0 = arith.constant 0 : i32
    %c0_i32_1 = arith.constant 0 : i32
    return %c0_i32, %c0_i32_0 : i32, i32
  }
  func.func @transform_6(%arg0: i32) -> i32 {
    %c0_i32 = arith.constant 0 : i32
    %c0_i32_0 = arith.constant 0 : i32
    return %c0_i32 : i32
  }
  func.func @transform_7(%arg0: i32) -> (i32, i32) {
    %c0_i32 = arith.constant 0 : i32
    %c0_i32_0 = arith.constant 0 : i32
    return %arg0, %c0_i32 : i32, i32
  }
}

</mosaic_0001>

<bundles_post_ra>
// kernel: mlp_baseline_forward.1
= control target key start
LH: loop header
LB: loop body
LE: loop exit
PB: predicated region body
PF: predicated region fallthrough
CT: control target
= control target key end

     0   :  { %vm739_vm0 = vcmask 523264   ;;  %vm870_vm1 = vcmask 7168   ;;  %s1562_s1 = inlined_call_operand.vmem [shape: bf16[128,128], index: 1, kind: input, shape index: {}]   ;;  %s1563_s0 = inlined_call_operand.vmem [shape: bf16[256,128], index: 0, kind: input, shape index: {}]   ;;  %s1564_s3 = inlined_call_operand.vmem [shape: bf16[128,64], index: 3, kind: input, shape index: {}]   ;;  %s1565_s2 = inlined_call_operand.vmem [shape: f32[1,128], index: 2, kind: input, shape index: {}]   ;;  %s1566_s4 = inlined_call_operand.vmem [shape: f32[1,64], index: 4, kind: input, shape index: {}]   ;;  %s1567_s5 = inlined_call_operand.vmem [shape: f32[1,64], index: 5, kind: input, shape index: {}]   ;;  %s1568_s6 = inlined_call_operand.<no memory space> [shape: f32[1], index: 6, kind: input, shape index: {}]   ;;  %s1569_s7 = inlined_call_operand.vmem [shape: f32[256,1], index: 7, kind: output, shape index: {}]  }
   0x1   :  { %v1086_v0 = vld [vmem:[%s1562_s1 + $0x38] sm:$0xff]   ;;  %v1087_v1 = vld [vmem:[%s1562_s1 + $0x30] sm:$0xff]   ;;  %v1088_v2 = vld [vmem:[%s1562_s1 + $0x28] sm:$0xff]  }
   0x2   :  { %990 = vmatprep.subr.bf16.mxu0 %v1086_v0  ;;  %v1089_v3 = vld [vmem:[%s1562_s1 + $0x20] sm:$0xff]   ;;  %v1090_v5 = vld [vmem:[%s1562_s1 + $0x18] sm:$0xff]   ;;  %v1091_v6 = vld [vmem:[%s1562_s1 + $0x10] sm:$0xff]  }
   0x3   :  { %991 = vmatpush3.bf16.msra.mxu0 %v1086_v0  ;;  %v1094_v4 = vld [vmem:[%s1563_s0] sm:$0xff]   ;;  %v1092_v7 = vld [vmem:[%s1562_s1 + $0x8] sm:$0xff]   ;;  %v1110_v9 = vld [vmem:[%s1564_s3 + $0x38] sm:$0xff]  }
   0x4   :  { %992 = vmatprep.subr.bf16.mxu0 %v1087_v1  ;;  %1006 = vmatprep.mubr.bf16.mxu0 %v1094_v4  ;;  %v1093_v8 = vld [vmem:[%s1562_s1] sm:$0xff]   ;;  %v1111_v10 = vld [vmem:[%s1564_s3 + $0x30] sm:$0xff]   ;;  %v1095_v11 = vld [vmem:[%s1563_s0 + $0x8] sm:$0xff]  }
   0x5   :  { %1038 = vmatprep.subr.bf16.mxu1 %v1110_v9  ;;  %v1112_v12 = vld [vmem:[%s1564_s3 + $0x28] sm:$0xff]   ;;  %v1096_v13 = vld [vmem:[%s1563_s0 + $0x10] sm:$0xff]   ;;  %v1113_v14 = vld [vmem:[%s1564_s3 + $0x20] sm:$0xff]  }
   0x6   :  { %1039 = vmatpush3.bf16.msra.mxu1 %v1110_v9  ;;  %v1114_v15 = vld [vmem:[%s1564_s3 + $0x18] sm:$0xff]   ;;  %v1098_v17 = vld [vmem:[%s1563_s0 + $0x20] sm:$0xff]   ;;  %v1099_v18 = vld [vmem:[%s1563_s0 + $0x28] sm:$0xff]  }
   0x7   :  { %993 = vmatpush3.bf16.msra.mxu0 %v1087_v1  ;;  %1040 = vmatprep.subr.bf16.mxu1 %v1111_v10  ;;  %v1097_v16 = vld [vmem:[%s1563_s0 + $0x18] sm:$0xff]   ;;  %v1100_v19 = vld [vmem:[%s1563_s0 + $0x30] sm:$0xff]   ;;  %v1102_v21 = vld [vmem:[%s1563_s0 + $0x40] sm:$0xff]  }
   0x8   :  { %994 = vmatprep.subr.bf16.mxu0 %v1088_v2  ;;  %v1101_v20 = vld [vmem:[%s1563_s0 + $0x38] sm:$0xff]   ;;  %v1103_v22 = vld [vmem:[%s1563_s0 + $0x48] sm:$0xff]   ;;  %v1104_v23 = vld [vmem:[%s1563_s0 + $0x50] sm:$0xff]  }
   0x9   :  { %v1105_v24 = vld [vmem:[%s1563_s0 + $0x58] sm:$0xff]   ;;  %v1106_v25 = vld [vmem:[%s1563_s0 + $0x60] sm:$0xff]   ;;  %v1107_v26 = vld [vmem:[%s1563_s0 + $0x68] sm:$0xff]  }
   0xa   :  { %1041 = vmatpush3.bf16.msra.mxu1 %v1111_v10  ;;  %v1108_v27 = vld [vmem:[%s1563_s0 + $0x70] sm:$0xff]   ;;  %v1109_v28 = vld [vmem:[%s1563_s0 + $0x78] sm:$0xff]   ;;  %v1116_v30 = vld [vmem:[%s1564_s3 + $0x8] sm:$0xff]  }
   0xb   :  { %995 = vmatpush3.bf16.msra.mxu0 %v1088_v2  ;;  %1042 = vmatprep.subr.bf16.mxu1 %v1112_v12  ;;  %v1115_v29 = vld [vmem:[%s1564_s3 + $0x10] sm:$0xff]   ;;  %v1117_v31 = vld [vmem:[%s1564_s3] sm:$0xff]  }
   0xc   :  { %996 = vmatprep.subr.bf16.mxu0 %v1089_v3  ;;  %v1257_v34 = vld [vmem:[%s1565_s2] ss:$0 sm:$0xff] }
   0xe   :  { %1043 = vmatpush3.bf16.msra.mxu1 %v1112_v12 }
   0xf   :  { %997 = vmatpush3.bf16.msra.mxu0 %v1089_v3  ;;  %1044 = vmatprep.subr.bf16.mxu1 %v1113_v14 }
  0x10   :  { %998 = vmatprep.subr.bf16.mxu0 %v1090_v5 }
  0x12   :  { %1045 = vmatpush3.bf16.msra.mxu1 %v1113_v14 }
  0x13   :  { %999 = vmatpush3.bf16.msra.mxu0 %v1090_v5  ;;  %1046 = vmatprep.subr.bf16.mxu1 %v1114_v15 }
  0x14   :  { %1000 = vmatprep.subr.bf16.mxu0 %v1091_v6 }
  0x16   :  { %1047 = vmatpush3.bf16.msra.mxu1 %v1114_v15 }
  0x17   :  { %1001 = vmatpush3.bf16.msra.mxu0 %v1091_v6  ;;  %1048 = vmatprep.subr.bf16.mxu1 %v1115_v29 }
  0x18   :  { %1002 = vmatprep.subr.bf16.mxu0 %v1092_v7 }
  0x1a   :  { %1049 = vmatpush3.bf16.msra.mxu1 %v1115_v29 }
  0x1b   :  { %1003 = vmatpush3.bf16.msra.mxu0 %v1092_v7  ;;  %1050 = vmatprep.subr.bf16.mxu1 %v1116_v30 }
  0x1c   :  { %1004 = vmatprep.subr.bf16.mxu0 %v1093_v8 }
  0x1e   :  { %1051 = vmatpush3.bf16.msra.mxu1 %v1116_v30 }
  0x1f   :  { %1005 = vmatpush3.bf16.msra.mxu0 %v1093_v8  ;;  %1052 = vmatprep.subr.bf16.mxu1 %v1117_v31 }
  0x22   :  { %1007 = vmatmul.mubr.bf16.vlgmr.msra.gmra.mxu0 %v1095_v11  ;;  %1053 = vmatpush3.bf16.msra.mxu1 %v1117_v31 }
  0x23   :  { %1010 = vmatprep.mubr.bf16.mxu0 %v1096_v13 }
  0x2a   :  { %1011 = vmatmul.mubr.bf16.gmra.mxu0 %v1097_v16 }
  0x2b   :  { %1014 = vmatprep.mubr.bf16.mxu0 %v1098_v17 }
  0x32   :  { %1015 = vmatmul.mubr.bf16.gmra.mxu0 %v1099_v18 }
  0x33   :  { %1018 = vmatprep.mubr.bf16.mxu0 %v1100_v19 }
  0x3a   :  { %1019 = vmatmul.mubr.bf16.gmra.mxu0 %v1101_v20 }
  0x3b   :  { %1022 = vmatprep.mubr.bf16.mxu0 %v1102_v21 }
  0x42   :  { %1023 = vmatmul.mubr.bf16.gmra.mxu0 %v1103_v22 }
  0x43   :  { %1026 = vmatprep.mubr.bf16.mxu0 %v1104_v23 }
  0x4a   :  { %1027 = vmatmul.mubr.bf16.gmra.mxu0 %v1105_v24 }
  0x4b   :  { %1030 = vmatprep.mubr.bf16.mxu0 %v1106_v25 }
  0x52   :  { %1031 = vmatmul.mubr.bf16.gmra.mxu0 %v1107_v26 }
  0x53   :  { %1034 = vmatprep.mubr.bf16.mxu0 %v1108_v27 }
  0x5a   :  { %1035 = vmatmul.mubr.bf16.gmra.mxu0 %v1109_v28 }
  0xe2   :  { %v1008_v32 = vpop.f32.mrf.mxu0 }
  0xe3   :  { %v270_v38 = vadd.f32 %v1008_v32, %v1257_v34 }
  0xe4   :  { %v261_v33 = vpop.f32.mrf.mxu0 }
  0xe5   :  { %v262_v36 = vadd.f32 %v1257_v34, %v261_v33  ;;  %v390_v45 = vmax.f32 %v270_v38, 0.0 }
  0xe6   :  { %v1009_v35 = vpop.f32.mrf.mxu0 }
  0xe7   :  { %v273_v37 = vadd.f32 %v1009_v35, %v1257_v34  ;;  %v388_v43 = vmax.f32 %v262_v36, 0.0 }
  0xe8   :  { %v264_v39 = vpop.f32.mrf.mxu0 }
  0xe9   :  { %v265_v40 = vadd.f32 %v1257_v34, %v264_v39  ;;  %v391_v41 = vmax.f32 %v273_v37, 0.0 }
  0xea   :  { %v1012_v42 = vpop.f32.mrf.mxu0 }
  0xeb   :  { %v389_v44 = vmax.f32 %v265_v40, 0.0  ;;  %v421_v48 = vpack.c.bf16 %v391_v41, %v390_v45  ;;  %v286_v52 = vadd.f32 %v1012_v42, %v1257_v34 }
  0xec   :  { %v277_v46 = vpop.f32.mrf.mxu0 }
  0xed   :  { %v420_v47 = vpack.c.bf16 %v389_v44, %v388_v43  ;;  %v278_v50 = vadd.f32 %v1257_v34, %v277_v46  ;;  %v394_v59 = vmax.f32 %v286_v52, 0.0 }
  0xee   :  { %v1013_v49 = vpop.f32.mrf.mxu0 }
  0xef   :  { %v289_v51 = vadd.f32 %v1013_v49, %v1257_v34  ;;  %1054 = vmatprep.mubr.bf16.mxu1 %v420_v47  ;;  %v392_v57 = vmax.f32 %v278_v50, 0.0 }
  0xf0   :  { %v280_v53 = vpop.f32.mrf.mxu0  ;;  %1055 = vmatmul.mubr.bf16.vlgmr.msra.gmra.mxu1 %v421_v48 }
  0xf1   :  { %v281_v54 = vadd.f32 %v1257_v34, %v280_v53  ;;  %v395_v55 = vmax.f32 %v289_v51, 0.0 }
  0xf2   :  { %v1016_v56 = vpop.f32.mrf.mxu0 }
  0xf3   :  { %v393_v58 = vmax.f32 %v281_v54, 0.0  ;;  %v423_v62 = vpack.c.bf16 %v395_v55, %v394_v59  ;;  %v302_v2 = vadd.f32 %v1016_v56, %v1257_v34 }
  0xf4   :  { %v293_v60 = vpop.f32.mrf.mxu0 }
  0xf5   :  { %v422_v61 = vpack.c.bf16 %v393_v58, %v392_v57  ;;  %v294_v0 = vadd.f32 %v1257_v34, %v293_v60  ;;  %v398_v9 = vmax.f32 %v302_v2, 0.0 }
  0xf6   :  { %v1017_v63 = vpop.f32.mrf.mxu0 }
  0xf7   :  { %v305_v1 = vadd.f32 %v1017_v63, %v1257_v34  ;;  %1058 = vmatprep.mubr.bf16.mxu1 %v422_v61  ;;  %v396_v7 = vmax.f32 %v294_v0, 0.0 }
  0xf8   :  { %v296_v3 = vpop.f32.mrf.mxu0  ;;  %1059 = vmatmul.mubr.bf16.gmra.mxu1 %v423_v62 }
  0xf9   :  { %v297_v4 = vadd.f32 %v1257_v34, %v296_v3  ;;  %v399_v5 = vmax.f32 %v305_v1, 0.0 }
  0xfa   :  { %v1020_v6 = vpop.f32.mrf.mxu0 }
  0xfb   :  { %v397_v8 = vmax.f32 %v297_v4, 0.0  ;;  %v425_v12 = vpack.c.bf16 %v399_v5, %v398_v9  ;;  %v318_v16 = vadd.f32 %v1020_v6, %v1257_v34 }
  0xfc   :  { %v309_v10 = vpop.f32.mrf.mxu0 }
  0xfd   :  { %v424_v11 = vpack.c.bf16 %v397_v8, %v396_v7  ;;  %v310_v14 = vadd.f32 %v1257_v34, %v309_v10  ;;  %v402_v23 = vmax.f32 %v318_v16, 0.0 }
  0xfe   :  { %v1021_v13 = vpop.f32.mrf.mxu0 }
  0xff   :  { %v321_v15 = vadd.f32 %v1021_v13, %v1257_v34  ;;  %1062 = vmatprep.mubr.bf16.mxu1 %v424_v11  ;;  %v400_v21 = vmax.f32 %v310_v14, 0.0 }
 0x100   :  { %v312_v17 = vpop.f32.mrf.mxu0  ;;  %1063 = vmatmul.mubr.bf16.gmra.mxu1 %v425_v12 }
 0x101   :  { %v313_v18 = vadd.f32 %v1257_v34, %v312_v17  ;;  %v403_v19 = vmax.f32 %v321_v15, 0.0 }
 0x102   :  { %v1024_v20 = vpop.f32.mrf.mxu0 }
 0x103   :  { %v401_v22 = vmax.f32 %v313_v18, 0.0  ;;  %v427_v26 = vpack.c.bf16 %v403_v19, %v402_v23  ;;  %v334_v30 = vadd.f32 %v1024_v20, %v1257_v34  ;;  %v1294_v18 = vld [vmem:[%s1566_s4] ss:$0 sm:$0xff] }
 0x104   :  { %v325_v24 = vpop.f32.mrf.mxu0 }
 0x105   :  { %v426_v25 = vpack.c.bf16 %v401_v22, %v400_v21  ;;  %v326_v28 = vadd.f32 %v1257_v34, %v325_v24  ;;  %v406_v38 = vmax.f32 %v334_v30, 0.0 }
 0x106   :  { %v1025_v27 = vpop.f32.mrf.mxu0 }
 0x107   :  { %v337_v29 = vadd.f32 %v1025_v27, %v1257_v34  ;;  %1066 = vmatprep.mubr.bf16.mxu1 %v426_v25  ;;  %v404_v36 = vmax.f32 %v326_v28, 0.0 }
 0x108   :  { %v328_v31 = vpop.f32.mrf.mxu0  ;;  %1067 = vmatmul.mubr.bf16.gmra.mxu1 %v427_v26 }
 0x109   :  { %v329_v32 = vadd.f32 %v1257_v34, %v328_v31  ;;  %v407_v33 = vmax.f32 %v337_v29, 0.0 }
 0x10a   :  { %v1028_v35 = vpop.f32.mrf.mxu0 }
 0x10b   :  { %v405_v37 = vmax.f32 %v329_v32, 0.0  ;;  %v429_v41 = vpack.c.bf16 %v407_v33, %v406_v38  ;;  %v350_v45 = vadd.f32 %v1028_v35, %v1257_v34 }
 0x10c   :  { %v341_v39 = vpop.f32.mrf.mxu0 }
 0x10d   :  { %v428_v40 = vpack.c.bf16 %v405_v37, %v404_v36  ;;  %v342_v43 = vadd.f32 %v1257_v34, %v341_v39  ;;  %v410_v52 = vmax.f32 %v350_v45, 0.0 }
 0x10e   :  { %v1029_v42 = vpop.f32.mrf.mxu0 }
 0x10f   :  { %v353_v44 = vadd.f32 %v1029_v42, %v1257_v34  ;;  %1070 = vmatprep.mubr.bf16.mxu1 %v428_v40  ;;  %v408_v50 = vmax.f32 %v342_v43, 0.0 }
 0x110   :  { %v344_v46 = vpop.f32.mrf.mxu0  ;;  %1071 = vmatmul.mubr.bf16.gmra.mxu1 %v429_v41 }
 0x111   :  { %v345_v47 = vadd.f32 %v1257_v34, %v344_v46  ;;  %v411_v48 = vmax.f32 %v353_v44, 0.0 }
 0x112   :  { %v1032_v49 = vpop.f32.mrf.mxu0 }
 0x113   :  { %v409_v51 = vmax.f32 %v345_v47, 0.0  ;;  %v431_v55 = vpack.c.bf16 %v411_v48, %v410_v52  ;;  %v366_v59 = vadd.f32 %v1032_v49, %v1257_v34 }
 0x114   :  { %v357_v53 = vpop.f32.mrf.mxu0 }
 0x115   :  { %v430_v54 = vpack.c.bf16 %v409_v51, %v408_v50  ;;  %v358_v57 = vadd.f32 %v1257_v34, %v357_v53  ;;  %v414_v2 = vmax.f32 %v366_v59, 0.0 }
 0x116   :  { %v1033_v56 = vpop.f32.mrf.mxu0 }
 0x117   :  { %v369_v58 = vadd.f32 %v1033_v56, %v1257_v34  ;;  %1074 = vmatprep.mubr.bf16.mxu1 %v430_v54  ;;  %v412_v0 = vmax.f32 %v358_v57, 0.0 }
 0x118   :  { %v360_v60 = vpop.f32.mrf.mxu0  ;;  %1075 = vmatmul.mubr.bf16.gmra.mxu1 %v431_v55 }
 0x119   :  { %v361_v61 = vadd.f32 %v1257_v34, %v360_v60  ;;  %v415_v62 = vmax.f32 %v369_v58, 0.0 }
 0x11a   :  { %v1036_v63 = vpop.f32.mrf.mxu0 }
 0x11b   :  { %v413_v1 = vmax.f32 %v361_v61, 0.0  ;;  %v433_v5 = vpack.c.bf16 %v415_v62, %v414_v2  ;;  %v382_v9 = vadd.f32 %v1036_v63, %v1257_v34 }
 0x11c   :  { %v373_v3 = vpop.f32.mrf.mxu0 }
 0x11d   :  { %v432_v4 = vpack.c.bf16 %v413_v1, %v412_v0  ;;  %v374_v7 = vadd.f32 %v1257_v34, %v373_v3  ;;  %v418_v15 = vmax.f32 %v382_v9, 0.0 }
 0x11e   :  { %v1037_v6 = vpop.f32.mrf.mxu0 }
 0x11f   :  { %v385_v8 = vadd.f32 %v1037_v6, %v1257_v34  ;;  %1078 = vmatprep.mubr.bf16.mxu1 %v432_v4  ;;  %v416_v13 = vmax.f32 %v374_v7, 0.0 }
 0x120   :  { %v376_v10 = vpop.f32.mrf.mxu0  ;;  %1079 = vmatmul.mubr.bf16.gmra.mxu1 %v433_v5 }
 0x121   :  { %v377_v11 = vadd.f32 %v1257_v34, %v376_v10  ;;  %v419_v12 = vmax.f32 %v385_v8, 0.0  ;;  %v1300_v34 = vld [vmem:[%s1567_s5] ss:$0 sm:$0xff] }
 0x123   :  { %v417_v14 = vmax.f32 %v377_v11, 0.0  ;;  %v435_v17 = vpack.c.bf16 %v419_v12, %v418_v15 }
 0x125   :  { %v434_v16 = vpack.c.bf16 %v417_v14, %v416_v13 }
 0x127   :  { %1082 = vmatprep.mubr.bf16.mxu1 %v434_v16 }
 0x128   :  { %1083 = vmatmul.mubr.bf16.gmra.mxu1 %v435_v17 }
 0x1b0   :  { %v1056_v19 = vpop.f32.mrf.mxu1 }
 0x1b1   :  { %v550_v20 = vadd.f32 %v1056_v19, %v1294_v18 }
 0x1b2   :  { %v541_v21 = vpop.f32.mrf.mxu1 }
 0x1b3   :  { %v670_v22 = vmax.f32 %v550_v20, 0.0  ;;  %v542_v23 = vadd.f32 %v1294_v18, %v541_v21 }
 0x1b4   :  { %v1057_v24 = vpop.f32.mrf.mxu1 }
 0x1b5   :  { %v668_v25 = vmax.f32 %v542_v23, 0.0  ;;  %v553_v26 = vadd.f32 %v1057_v24, %v1294_v18  ;;  %v709_v27 = vmul.f32 %v1300_v34, %v670_v22 }
 0x1b6   :  { %v544_v28 = vpop.f32.mrf.mxu1 }
 0x1b7   :  { %v671_v29 = vmax.f32 %v553_v26, 0.0  ;;  %v545_v30 = vadd.f32 %v1294_v18, %v544_v28  ;;  %v746_v31 = vsel %vm739_vm0, %v709_v27, 0.0  ;;  %v707_v32 = vmul.f32 %v1300_v34, %v668_v25 }
 0x1b8   :  { %747 = vadd.xlane.f32.xlu1 %v746_v31  ;;  %v1060_v33 = vpop.f32.mrf.mxu1 }
 0x1b9   :  { %v669_v35 = vmax.f32 %v545_v30, 0.0  ;;  %v566_v36 = vadd.f32 %v1060_v33, %v1294_v18  ;;  %v740_v37 = vsel %vm739_vm0, %v707_v32, 0.0  ;;  %v710_v38 = vmul.f32 %v1300_v34, %v671_v29 }
 0x1ba   :  { %v557_v39 = vpop.f32.mrf.mxu1  ;;  %741 = vadd.xlane.f32.xlu0 %v740_v37 }
 0x1bb   :  { %v674_v40 = vmax.f32 %v566_v36, 0.0  ;;  %v558_v41 = vadd.f32 %v1294_v18, %v557_v39  ;;  %v749_v42 = vsel %vm739_vm0, %v710_v38, 0.0  ;;  %v708_v43 = vmul.f32 %v1300_v34, %v669_v35 }
 0x1bc   :  { %750 = vadd.xlane.f32.xlu1 %v749_v42  ;;  %v1061_v44 = vpop.f32.mrf.mxu1 }
 0x1bd   :  { %v672_v45 = vmax.f32 %v558_v41, 0.0  ;;  %v569_v46 = vadd.f32 %v1061_v44, %v1294_v18  ;;  %v743_v47 = vsel %vm739_vm0, %v708_v43, 0.0  ;;  %v713_v48 = vmul.f32 %v1300_v34, %v674_v40 }
 0x1be   :  { %v560_v49 = vpop.f32.mrf.mxu1  ;;  %744 = vadd.xlane.f32.xlu0 %v743_v47 }
 0x1bf   :  { %v675_v50 = vmax.f32 %v569_v46, 0.0  ;;  %v561_v51 = vadd.f32 %v1294_v18, %v560_v49  ;;  %v758_v53 = vsel %vm739_vm0, %v713_v48, 0.0  ;;  %v711_v57 = vmul.f32 %v1300_v34, %v672_v45 }
 0x1c0   :  { %v1064_v52 = vpop.f32.mrf.mxu1 }
 0x1c1   :  { %v673_v54 = vmax.f32 %v561_v51, 0.0  ;;  %v582_v55 = vadd.f32 %v1064_v52, %v1294_v18  ;;  %v714_v56 = vmul.f32 %v1300_v34, %v675_v50  ;;  %v752_v2 = vsel %vm739_vm0, %v711_v57, 0.0 }
 0x1c2   :  { %v573_v58 = vpop.f32.mrf.mxu1  ;;  %759 = vadd.xlane.f32.xlu0 %v758_v53 }
 0x1c3   :  { %v678_v59 = vmax.f32 %v582_v55, 0.0  ;;  %v574_v60 = vadd.f32 %v1294_v18, %v573_v58  ;;  %v761_v61 = vsel %vm739_vm0, %v714_v56, 0.0  ;;  %v712_v62 = vmul.f32 %v1300_v34, %v673_v54 }
 0x1c4   :  { %762 = vadd.xlane.f32.xlu1 %v761_v61  ;;  %v1065_v63 = vpop.f32.mrf.mxu1 }
 0x1c5   :  { %v676_v0 = vmax.f32 %v574_v60, 0.0  ;;  %v585_v1 = vadd.f32 %v1065_v63, %v1294_v18  ;;  %v717_v3 = vmul.f32 %v1300_v34, %v678_v59  ;;  %v755_v7 = vsel %vm739_vm0, %v712_v62, 0.0 }
 0x1c6   :  { %v576_v4 = vpop.f32.mrf.mxu1  ;;  %753 = vadd.xlane.f32.xlu0 %v752_v2 }
 0x1c7   :  { %v679_v5 = vmax.f32 %v585_v1, 0.0  ;;  %v577_v6 = vadd.f32 %v1294_v18, %v576_v4  ;;  %v770_v9 = vsel %vm739_vm0, %v717_v3, 0.0  ;;  %v715_v13 = vmul.f32 %v1300_v34, %v676_v0 }
 0x1c8   :  { %v1068_v8 = vpop.f32.mrf.mxu1  ;;  %756 = vadd.xlane.f32.xlu1 %v755_v7 }
 0x1c9   :  { %v677_v10 = vmax.f32 %v577_v6, 0.0  ;;  %v598_v11 = vadd.f32 %v1068_v8, %v1294_v18  ;;  %v718_v12 = vmul.f32 %v1300_v34, %v679_v5  ;;  %v764_v23 = vsel %vm739_vm0, %v715_v13, 0.0 }
 0x1ca   :  { %v589_v14 = vpop.f32.mrf.mxu1  ;;  %771 = vadd.xlane.f32.xlu0 %v770_v9 }
 0x1cb   :  { %v682_v15 = vmax.f32 %v598_v11, 0.0  ;;  %v590_v16 = vadd.f32 %v1294_v18, %v589_v14  ;;  %v773_v17 = vsel %vm739_vm0, %v718_v12, 0.0  ;;  %v716_v19 = vmul.f32 %v1300_v34, %v677_v10 }
 0x1cc   :  { %v1069_v20 = vpop.f32.mrf.mxu1  ;;  %774 = vadd.xlane.f32.xlu1 %v773_v17 }
 0x1cd   :  { %v680_v21 = vmax.f32 %v590_v16, 0.0  ;;  %v601_v22 = vadd.f32 %v1069_v20, %v1294_v18  ;;  %v721_v24 = vmul.f32 %v1300_v34, %v682_v15  ;;  %v767_v28 = vsel %vm739_vm0, %v716_v19, 0.0 }
 0x1ce   :  { %v592_v25 = vpop.f32.mrf.mxu1  ;;  %765 = vadd.xlane.f32.xlu0 %v764_v23 }
 0x1cf   :  { %v683_v26 = vmax.f32 %v601_v22, 0.0  ;;  %v593_v27 = vadd.f32 %v1294_v18, %v592_v25  ;;  %v782_v30 = vsel %vm739_vm0, %v721_v24, 0.0  ;;  %v719_v35 = vmul.f32 %v1300_v34, %v680_v21 }
 0x1d0   :  { %v1072_v29 = vpop.f32.mrf.mxu1  ;;  %768 = vadd.xlane.f32.xlu1 %v767_v28 }
 0x1d1   :  { %v681_v31 = vmax.f32 %v593_v27, 0.0  ;;  %v614_v32 = vadd.f32 %v1072_v29, %v1294_v18  ;;  %v722_v33 = vmul.f32 %v1300_v34, %v683_v26  ;;  %v776_v44 = vsel %vm739_vm0, %v719_v35, 0.0 }
 0x1d2   :  { %v605_v36 = vpop.f32.mrf.mxu1  ;;  %783 = vadd.xlane.f32.xlu0 %v782_v30 }
 0x1d3   :  { %v686_v37 = vmax.f32 %v614_v32, 0.0  ;;  %v606_v38 = vadd.f32 %v1294_v18, %v605_v36  ;;  %v785_v39 = vsel %vm739_vm0, %v722_v33, 0.0  ;;  %v720_v40 = vmul.f32 %v1300_v34, %v681_v31 }
 0x1d4   :  { %v1073_v41 = vpop.f32.mrf.mxu1  ;;  %786 = vadd.xlane.f32.xlu1 %v785_v39 }
 0x1d5   :  { %v684_v42 = vmax.f32 %v606_v38, 0.0  ;;  %v617_v43 = vadd.f32 %v1073_v41, %v1294_v18  ;;  %v725_v45 = vmul.f32 %v1300_v34, %v686_v37  ;;  %v779_v49 = vsel %vm739_vm0, %v720_v40, 0.0 }
 0x1d6   :  { %v608_v46 = vpop.f32.mrf.mxu1  ;;  %777 = vadd.xlane.f32.xlu0 %v776_v44 }
 0x1d7   :  { %v687_v47 = vmax.f32 %v617_v43, 0.0  ;;  %v609_v48 = vadd.f32 %v1294_v18, %v608_v46  ;;  %v794_v51 = vsel %vm739_vm0, %v725_v45, 0.0  ;;  %v723_v55 = vmul.f32 %v1300_v34, %v684_v42 }
 0x1d8   :  { %v1076_v50 = vpop.f32.mrf.mxu1  ;;  %780 = vadd.xlane.f32.xlu1 %v779_v49 }
 0x1d9   :  { %v685_v52 = vmax.f32 %v609_v48, 0.0  ;;  %v630_v53 = vadd.f32 %v1076_v50, %v1294_v18  ;;  %v726_v54 = vmul.f32 %v1300_v34, %v687_v47  ;;  %v788_v0 = vsel %vm739_vm0, %v723_v55, 0.0 }
 0x1da   :  { %v621_v56 = vpop.f32.mrf.mxu1  ;;  %795 = vadd.xlane.f32.xlu0 %v794_v51  ;;  %v1400_v55 = vstv %s1568_s6 }
 0x1db   :  { %v690_v57 = vmax.f32 %v630_v53, 0.0  ;;  %v622_v58 = vadd.f32 %v1294_v18, %v621_v56  ;;  %v797_v59 = vsel %vm739_vm0, %v726_v54, 0.0  ;;  %v724_v60 = vmul.f32 %v1300_v34, %v685_v52 }
 0x1dc   :  { %v1077_v61 = vpop.f32.mrf.mxu1  ;;  %798 = vadd.xlane.f32.xlu1 %v797_v59 }
 0x1dd   :  { %v688_v62 = vmax.f32 %v622_v58, 0.0  ;;  %v633_v63 = vadd.f32 %v1077_v61, %v1294_v18  ;;  %v729_v1 = vmul.f32 %v1300_v34, %v690_v57  ;;  %v791_v5 = vsel %vm739_vm0, %v724_v60, 0.0 }
 0x1de   :  { %v624_v2 = vpop.f32.mrf.mxu1  ;;  %789 = vadd.xlane.f32.xlu0 %v788_v0 }
 0x1df   :  { %v691_v3 = vmax.f32 %v633_v63, 0.0  ;;  %v625_v4 = vadd.f32 %v1294_v18, %v624_v2  ;;  %v806_v7 = vsel %vm739_vm0, %v729_v1, 0.0  ;;  %v727_v11 = vmul.f32 %v1300_v34, %v688_v62 }
 0x1e0   :  { %v1080_v6 = vpop.f32.mrf.mxu1  ;;  %792 = vadd.xlane.f32.xlu1 %v791_v5 }
 0x1e1   :  { %v689_v8 = vmax.f32 %v625_v4, 0.0  ;;  %v646_v9 = vadd.f32 %v1080_v6, %v1294_v18  ;;  %v730_v10 = vmul.f32 %v1300_v34, %v691_v3  ;;  %v800_v21 = vsel %vm739_vm0, %v727_v11, 0.0 }
 0x1e2   :  { %v637_v12 = vpop.f32.mrf.mxu1  ;;  %807 = vadd.xlane.f32.xlu0 %v806_v7 }
 0x1e3   :  { %v694_v13 = vmax.f32 %v646_v9, 0.0  ;;  %v638_v14 = vadd.f32 %v1294_v18, %v637_v12  ;;  %v809_v15 = vsel %vm739_vm0, %v730_v10, 0.0  ;;  %v728_v16 = vmul.f32 %v1300_v34, %v689_v8 }
 0x1e4   :  { %v1081_v17 = vpop.f32.mrf.mxu1  ;;  %810 = vadd.xlane.f32.xlu1 %v809_v15 }
 0x1e5   :  { %v692_v19 = vmax.f32 %v638_v14, 0.0  ;;  %v649_v20 = vadd.f32 %v1081_v17, %v1294_v18  ;;  %v733_v22 = vmul.f32 %v1300_v34, %v694_v13  ;;  %v803_v26 = vsel %vm739_vm0, %v728_v16, 0.0 }
 0x1e6   :  { %v640_v23 = vpop.f32.mrf.mxu1  ;;  %801 = vadd.xlane.f32.xlu0 %v800_v21 }
 0x1e7   :  { %v695_v24 = vmax.f32 %v649_v20, 0.0  ;;  %v641_v25 = vadd.f32 %v1294_v18, %v640_v23  ;;  %v818_v28 = vsel %vm739_vm0, %v733_v22, 0.0  ;;  %v731_v32 = vmul.f32 %v1300_v34, %v692_v19 }
 0x1e8   :  { %v1084_v27 = vpop.f32.mrf.mxu1  ;;  %804 = vadd.xlane.f32.xlu1 %v803_v26 }
 0x1e9   :  { %v693_v29 = vmax.f32 %v641_v25, 0.0  ;;  %v662_v30 = vadd.f32 %v1084_v27, %v1294_v18  ;;  %v734_v31 = vmul.f32 %v1300_v34, %v695_v24  ;;  %v812_v42 = vsel %vm739_vm0, %v731_v32, 0.0 }
 0x1ea   :  { %v653_v33 = vpop.f32.mrf.mxu1  ;;  %819 = vadd.xlane.f32.xlu0 %v818_v28 }
 0x1eb   :  { %v654_v35 = vadd.f32 %v1294_v18, %v653_v33  ;;  %v821_v36 = vsel %vm739_vm0, %v734_v31, 0.0  ;;  %v732_v37 = vmul.f32 %v1300_v34, %v693_v29  ;;  %v698_v39 = vmax.f32 %v662_v30, 0.0 }
 0x1ec   :  { %v1085_v38 = vpop.f32.mrf.mxu1  ;;  %822 = vadd.xlane.f32.xlu1 %v821_v36 }
 0x1ed   :  { %v696_v40 = vmax.f32 %v654_v35, 0.0  ;;  %v665_v41 = vadd.f32 %v1085_v38, %v1294_v18  ;;  %v815_v46 = vsel %vm739_vm0, %v732_v37, 0.0  ;;  %v737_v50 = vmul.f32 %v1300_v34, %v698_v39 }
 0x1ee   :  { %v656_v43 = vpop.f32.mrf.mxu1  ;;  %813 = vadd.xlane.f32.xlu0 %v812_v42 }
 0x1ef   :  { %v699_v44 = vmax.f32 %v665_v41, 0.0  ;;  %v657_v45 = vadd.f32 %v1294_v18, %v656_v43  ;;  %v735_v47 = vmul.f32 %v1300_v34, %v696_v40  ;;  %v830_v18 = vsel %vm739_vm0, %v737_v50, 0.0 }
 0x1f0   :  { %816 = vadd.xlane.f32.xlu1 %v815_v46 }
 0x1f1   :  { %v697_v48 = vmax.f32 %v657_v45, 0.0  ;;  %v824_v49 = vsel %vm739_vm0, %v735_v47, 0.0  ;;  %v738_v51 = vmul.f32 %v1300_v34, %v699_v44 }
 0x1f2   :  { %825 = vadd.xlane.f32.xlu0 %v824_v49 }
 0x1f3   :  { %v736_v52 = vmul.f32 %v1300_v34, %v697_v48  ;;  %v833_v53 = vsel %vm739_vm0, %v738_v51, 0.0 }
 0x1f5   :  { %v827_v54 = vsel %vm739_vm0, %v736_v52, 0.0 }
 0x1f6   :  { %828 = vadd.xlane.f32.xlu1 %v827_v54  ;;  %831 = vadd.xlane.f32.xlu0 %v830_v18 }
 0x1fa   :  { %834 = vadd.xlane.f32.xlu1 %v833_v53 }
 0x241   :  { %v748_v56 = vpop.xlane.xlu1 %747 }
 0x242   :  { %v840_v57 = vadd.f32 %v1400_v55, %v748_v56 }
 0x243   :  { %v742_v58 = vpop.xlane.xlu0 %741 }
 0x244   :  { %873 = vst.msk [vmem:[%s1569_s7 + $0x10] sm:$0xff] %vm870_vm1, %v840_v57  ;;  %v838_v34 = vadd.f32 %v1400_v55, %v742_v58 }
 0x245   :  { %v751_v59 = vpop.xlane.xlu1 %750 }
 0x246   :  { %871 = vst.msk [vmem:[%s1569_s7] sm:$0xff] %vm870_vm1, %v838_v34  ;;  %v841_v60 = vadd.f32 %v1400_v55, %v751_v59 }
 0x247   :  { %v745_v61 = vpop.xlane.xlu0 %744 }
 0x248   :  { %874 = vst.msk [vmem:[%s1569_s7 + $0x18] sm:$0xff] %vm870_vm1, %v841_v60  ;;  %v839_v62 = vadd.f32 %v1400_v55, %v745_v61 }
 0x24a   :  { %872 = vst.msk [vmem:[%s1569_s7 + $0x8] sm:$0xff] %vm870_vm1, %v839_v62 }
 0x24b   :  { %v760_v63 = vpop.xlane.xlu0 %759 }
 0x24c   :  { %v844_v0 = vadd.f32 %v1400_v55, %v760_v63 }
 0x24d   :  { %v763_v1 = vpop.xlane.xlu1 %762 }
 0x24e   :  { %877 = vst.msk [vmem:[%s1569_s7 + $0x30] sm:$0xff] %vm870_vm1, %v844_v0  ;;  %v845_v2 = vadd.f32 %v1400_v55, %v763_v1 }
 0x24f   :  { %v754_v3 = vpop.xlane.xlu0 %753 }
 0x250   :  { %878 = vst.msk [vmem:[%s1569_s7 + $0x38] sm:$0xff] %vm870_vm1, %v845_v2  ;;  %v842_v4 = vadd.f32 %v1400_v55, %v754_v3 }
 0x251   :  { %v757_v5 = vpop.xlane.xlu1 %756 }
 0x252   :  { %875 = vst.msk [vmem:[%s1569_s7 + $0x20] sm:$0xff] %vm870_vm1, %v842_v4  ;;  %v843_v6 = vadd.f32 %v1400_v55, %v757_v5 }
 0x253   :  { %v772_v7 = vpop.xlane.xlu0 %771 }
 0x254   :  { %876 = vst.msk [vmem:[%s1569_s7 + $0x28] sm:$0xff] %vm870_vm1, %v843_v6  ;;  %v848_v8 = vadd.f32 %v1400_v55, %v772_v7 }
 0x255   :  { %v775_v9 = vpop.xlane.xlu1 %774 }
 0x256   :  { %881 = vst.msk [vmem:[%s1569_s7 + $0x50] sm:$0xff] %vm870_vm1, %v848_v8  ;;  %v849_v10 = vadd.f32 %v1400_v55, %v775_v9 }
 0x257   :  { %v766_v11 = vpop.xlane.xlu0 %765 }
 0x258   :  { %882 = vst.msk [vmem:[%s1569_s7 + $0x58] sm:$0xff] %vm870_vm1, %v849_v10  ;;  %v846_v12 = vadd.f32 %v1400_v55, %v766_v11 }
 0x259   :  { %v769_v13 = vpop.xlane.xlu1 %768 }
 0x25a   :  { %879 = vst.msk [vmem:[%s1569_s7 + $0x40] sm:$0xff] %vm870_vm1, %v846_v12  ;;  %v847_v14 = vadd.f32 %v1400_v55, %v769_v13 }
 0x25b   :  { %v784_v15 = vpop.xlane.xlu0 %783 }
 0x25c   :  { %880 = vst.msk [vmem:[%s1569_s7 + $0x48] sm:$0xff] %vm870_vm1, %v847_v14  ;;  %v852_v16 = vadd.f32 %v1400_v55, %v784_v15 }
 0x25d   :  { %v787_v17 = vpop.xlane.xlu1 %786 }
 0x25e   :  { %885 = vst.msk [vmem:[%s1569_s7 + $0x70] sm:$0xff] %vm870_vm1, %v852_v16  ;;  %v853_v19 = vadd.f32 %v1400_v55, %v787_v17 }
 0x25f   :  { %v778_v20 = vpop.xlane.xlu0 %777 }
 0x260   :  { %886 = vst.msk [vmem:[%s1569_s7 + $0x78] sm:$0xff] %vm870_vm1, %v853_v19  ;;  %v850_v21 = vadd.f32 %v1400_v55, %v778_v20 }
 0x261   :  { %v781_v22 = vpop.xlane.xlu1 %780 }
 0x262   :  { %883 = vst.msk [vmem:[%s1569_s7 + $0x60] sm:$0xff] %vm870_vm1, %v850_v21  ;;  %v851_v23 = vadd.f32 %v1400_v55, %v781_v22 }
 0x263   :  { %v796_v24 = vpop.xlane.xlu0 %795 }
 0x264   :  { %884 = vst.msk [vmem:[%s1569_s7 + $0x68] sm:$0xff] %vm870_vm1, %v851_v23  ;;  %v856_v25 = vadd.f32 %v1400_v55, %v796_v24 }
 0x265   :  { %v799_v26 = vpop.xlane.xlu1 %798 }
 0x266   :  { %889 = vst.msk [vmem:[%s1569_s7 + $0x90] sm:$0xff] %vm870_vm1, %v856_v25  ;;  %v857_v27 = vadd.f32 %v1400_v55, %v799_v26 }
 0x267   :  { %v790_v28 = vpop.xlane.xlu0 %789 }
 0x268   :  { %890 = vst.msk [vmem:[%s1569_s7 + $0x98] sm:$0xff] %vm870_vm1, %v857_v27  ;;  %v854_v29 = vadd.f32 %v1400_v55, %v790_v28 }
 0x269   :  { %v793_v30 = vpop.xlane.xlu1 %792 }
 0x26a   :  { %887 = vst.msk [vmem:[%s1569_s7 + $0x80] sm:$0xff] %vm870_vm1, %v854_v29  ;;  %v855_v31 = vadd.f32 %v1400_v55, %v793_v30 }
 0x26b   :  { %v808_v32 = vpop.xlane.xlu0 %807 }
 0x26c   :  { %888 = vst.msk [vmem:[%s1569_s7 + $0x88] sm:$0xff] %vm870_vm1, %v855_v31  ;;  %v860_v33 = vadd.f32 %v1400_v55, %v808_v32 }
 0x26d   :  { %v811_v35 = vpop.xlane.xlu1 %810 }
 0x26e   :  { %893 = vst.msk [vmem:[%s1569_s7 + $0xb0] sm:$0xff] %vm870_vm1, %v860_v33  ;;  %v861_v36 = vadd.f32 %v1400_v55, %v811_v35 }
 0x26f   :  { %v802_v37 = vpop.xlane.xlu0 %801 }
 0x270   :  { %894 = vst.msk [vmem:[%s1569_s7 + $0xb8] sm:$0xff] %vm870_vm1, %v861_v36  ;;  %v858_v38 = vadd.f32 %v1400_v55, %v802_v37 }
 0x271   :  { %v805_v39 = vpop.xlane.xlu1 %804 }
 0x272   :  { %891 = vst.msk [vmem:[%s1569_s7 + $0xa0] sm:$0xff] %vm870_vm1, %v858_v38  ;;  %v859_v40 = vadd.f32 %v1400_v55, %v805_v39 }
 0x273   :  { %v820_v41 = vpop.xlane.xlu0 %819 }
 0x274   :  { %892 = vst.msk [vmem:[%s1569_s7 + $0xa8] sm:$0xff] %vm870_vm1, %v859_v40  ;;  %v864_v42 = vadd.f32 %v1400_v55, %v820_v41 }
 0x275   :  { %v823_v43 = vpop.xlane.xlu1 %822 }
 0x276   :  { %897 = vst.msk [vmem:[%s1569_s7 + $0xd0] sm:$0xff] %vm870_vm1, %v864_v42  ;;  %v865_v44 = vadd.f32 %v1400_v55, %v823_v43 }
 0x277   :  { %v814_v45 = vpop.xlane.xlu0 %813 }
 0x278   :  { %898 = vst.msk [vmem:[%s1569_s7 + $0xd8] sm:$0xff] %vm870_vm1, %v865_v44  ;;  %v862_v46 = vadd.f32 %v1400_v55, %v814_v45 }
 0x279   :  { %v817_v47 = vpop.xlane.xlu1 %816 }
 0x27a   :  { %895 = vst.msk [vmem:[%s1569_s7 + $0xc0] sm:$0xff] %vm870_vm1, %v862_v46  ;;  %v863_v48 = vadd.f32 %v1400_v55, %v817_v47 }
 0x27b   :  { %v826_v49 = vpop.xlane.xlu0 %825 }
 0x27c   :  { %896 = vst.msk [vmem:[%s1569_s7 + $0xc8] sm:$0xff] %vm870_vm1, %v863_v48  ;;  %v866_v50 = vadd.f32 %v1400_v55, %v826_v49 }
 0x27e   :  { %899 = vst.msk [vmem:[%s1569_s7 + $0xe0] sm:$0xff] %vm870_vm1, %v866_v50 }
 0x27f   :  { %v829_v51 = vpop.xlane.xlu1 %828  ;;  %v832_v52 = vpop.xlane.xlu0 %831 }
 0x280   :  { %v867_v53 = vadd.f32 %v1400_v55, %v829_v51  ;;  %v868_v54 = vadd.f32 %v1400_v55, %v832_v52 }
 0x282   :  { %900 = vst.msk [vmem:[%s1569_s7 + $0xe8] sm:$0xff] %vm870_vm1, %v867_v53  ;;  %901 = vst.msk [vmem:[%s1569_s7 + $0xf0] sm:$0xff] %vm870_vm1, %v868_v54 }
 0x283   :  { %v835_v18 = vpop.xlane.xlu1 %834 }
 0x284   :  { %v869_v56 = vadd.f32 %v1400_v55, %v835_v18 }
 0x286   :  { %902 = vst.msk [vmem:[%s1569_s7 + $0xf8] sm:$0xff] %vm870_vm1, %v869_v56 }

</bundles_post_ra>
